<compile_context>
chip_gen: v7x
topology: tpu7x:2x2x1
jax: 0.10.0
libtpu: 0.0.40
codegen_flags: <defaults>
</compile_context>

<pallas_src>
import functools

import jax
import jax.numpy as jnp
import numpy as np
from jax import lax
from jax.experimental import pallas as pl
from jax.experimental.pallas import tpu as pltpu

_MIB = 1024 * 1024


def _round_up(x, m):
    return ((x + m - 1) // m) * m


def _vmem_capacity_bytes():
    """Physical VMEM of the local chip; conservative fallback if unqueryable."""
    try:
        info = pltpu.get_tpu_info()
        cap = int(getattr(info, "vmem_capacity_bytes", 0))
        if cap > 0:
            return cap
    except Exception:
        pass
    return 64 * _MIB  # v7x-sized conservative default


# ---------------------------------------------------------------------------
# Kernel: one (tm, tn) output tile = one fat-K matmul + bias.
# ---------------------------------------------------------------------------
def _conv_matmul_kernel(a_ref, w_ref, b_ref, o_ref):
    # a_ref: (tm, K)  bf16 -- im2col rows (one row per output pixel)
    # w_ref: (K, tn)  bf16 -- packed 3x3 conv weights for this cout tile
    # b_ref: (1, tn)  f32
    # o_ref: (tm, tn) f32
    acc = jnp.dot(a_ref[...], w_ref[...], preferred_element_type=jnp.float32)
    o_ref[...] = (acc + b_ref[...]).astype(o_ref.dtype)


# ---------------------------------------------------------------------------
# Generation-aware tile selection.  Budget includes the double-buffered
# weight block, bias, A tile and output tile (the review's sizing fix).
# ---------------------------------------------------------------------------
def _pick_tiles(m_total, k, cout, *, block_m=None, block_n=None):
    vmem_cap = _vmem_capacity_bytes()
    # 64 MiB scoped limit on 128-MiB parts (v5e/v6e), stay at 32 MiB on v7x.
    vmem_limit = 64 * _MIB if vmem_cap >= 128 * _MIB else 32 * _MIB
    budget = vmem_limit - 8 * _MIB  # headroom for compiler-internal scratch

    # ---- cout tile ---------------------------------------------------------
    if block_n is not None:
        tn = int(block_n)
    elif cout <= 256:
        tn = cout
    else:
        # prefer 256-wide lanes; fall back to 128 when it reduces cout padding
        tn = 256 if (-cout) % 256 <= (-cout) % 128 else 128
    cout_pad = _round_up(cout, tn) if tn < cout else cout
    n_tiles = max(1, cout_pad // tn)

    # ---- row (output-pixel) tile -------------------------------------------
    w_bytes = 2 * k * tn * 2            # double-buffered weight block (bf16)
    b_bytes = 2 * tn * 4                # double-buffered bias row (f32)
    per_tm = 2 * (k * 2 + tn * 4)       # dbl-buffered A row (bf16) + out row (f32)
    if block_m is not None:
        tm = max(8, _round_up(int(block_m), 8))
    else:
        avail = budget - w_bytes - b_bytes
        if avail <= per_tm * 8:
            tm = 8
        else:
            tm = (avail // per_tm // 8) * 8
        tm = max(8, min(tm, 4096))
        tm = min(tm, _round_up(m_total, 8))
        # keep >= 2 row tiles so both v7x TensorCores get work
        if m_total > 8:
            tm = min(tm, _round_up((m_total + 1) // 2, 8))
        # prefer an even number of row tiles (balanced across 2 cores)
        m_tiles = -(-m_total // tm)
        if m_tiles > 1 and m_tiles % 2 == 1:
            m_tiles += 1
            tm = max(8, _round_up(-(-m_total // m_tiles), 8))
    m_tiles = -(-m_total // tm)
    m_pad = m_tiles * tm
    return tm, tn, m_pad, cout_pad, m_tiles, n_tiles, vmem_limit


def downsample_forward(x_nchw, w_oihw, bias, *, block_m=None, block_n=None):
    """Conv2d(kernel=3, stride=2, padding=1) forward (PyTorch `Downsample`).

    x_nchw: (N, Cin, H, W); w_oihw: (Cout, Cin, 3, 3); bias: (Cout,).
    Returns (N, Cout, Ho, Wo) in x's dtype.
    """
    n, cin, h, w = x_nchw.shape
    cout, cin_w, kh_sz, kw_sz = w_oihw.shape
    assert cin_w == cin and kh_sz == 3 and kw_sz == 3
    ho = (h - 1) // 2 + 1
    wo = (w - 1) // 2 + 1

    # ---- host glue: NCHW -> NHWC bf16, pad, lane-dense im2col (M, 9*Cin) ----
    x_nhwc = jnp.transpose(x_nchw, (0, 2, 3, 1)).astype(jnp.bfloat16)
    pad_h = 2 * ho + 1 - (h + 1)
    pad_w = 2 * wo + 1 - (w + 1)
    x_pad = jnp.pad(x_nhwc, ((0, 0), (1, pad_h), (1, pad_w), (0, 0)))
    cols = []
    for kh in range(3):
        for kw in range(3):
            cols.append(x_pad[:, kh:kh + 2 * ho:2, kw:kw + 2 * wo:2, :])
    taps = jnp.concatenate(cols, axis=-1)              # (N, Ho, Wo, 9*Cin)
    m_total = n * ho * wo
    k = 9 * cin
    taps = taps.reshape(m_total, k)

    # ---- weights / bias packed to match the (kh, kw, cin) K ordering --------
    w_packed = jnp.transpose(w_oihw, (2, 3, 1, 0)).reshape(k, cout)
    w_packed = w_packed.astype(jnp.bfloat16)
    b_row = bias.reshape(1, cout).astype(jnp.float32)

    # ---- tiling --------------------------------------------------------------
    tm, tn, m_pad, cout_pad, m_tiles, n_tiles, vmem_limit = _pick_tiles(
        m_total, k, cout, block_m=block_m, block_n=block_n)
    if m_pad != m_total:
        taps = jnp.pad(taps, ((0, m_pad - m_total), (0, 0)))
    if cout_pad != cout:
        w_packed = jnp.pad(w_packed, ((0, 0), (0, cout_pad - cout)))
        b_row = jnp.pad(b_row, ((0, 0), (0, cout_pad - cout)))

    flops = 2 * m_pad * k * cout_pad
    bytes_accessed = (taps.size * 2 + w_packed.size * 2 + b_row.size * 4
                      + m_pad * cout_pad * 4)

    out_flat = pl.pallas_call(
        _conv_matmul_kernel,
        out_shape=jax.ShapeDtypeStruct((m_pad, cout_pad), jnp.float32),
        grid=(m_tiles, n_tiles),                       # cout axis innermost
        in_specs=[
            # A block index is constant across the inner cout axis -> no refetch
            pl.BlockSpec((tm, k), lambda i, j: (i, 0)),
            pl.BlockSpec((k, tn), lambda i, j: (0, j)),
            pl.BlockSpec((1, tn), lambda i, j: (0, j)),
        ],
        out_specs=pl.BlockSpec((tm, tn), lambda i, j: (i, j)),
        compiler_params=pltpu.CompilerParams(
            dimension_semantics=("parallel", "parallel"),
            vmem_limit_bytes=int(vmem_limit),
        ),
        cost_estimate=pl.CostEstimate(
            flops=int(flops), transcendentals=0,
            bytes_accessed=int(bytes_accessed)),
    )(taps, w_packed, b_row)

    # ---- glue: drop padding, back to NCHW ------------------------------------
    out = out_flat[:m_total, :cout].reshape(n, ho, wo, cout)
    return jnp.transpose(out, (0, 3, 1, 2)).astype(x_nchw.dtype)


if __name__ == "__main__":
    key = jax.random.PRNGKey(0)
    N, C, H, W = 2, 4, 16, 16
    Cout = C  # out_channels defaults to channels

    kx, kw, kb = jax.random.split(key, 3)
    x = jax.random.normal(kx, (N, C, H, W), dtype=jnp.float32)
    # deterministic parameter init (uniform, same shapes as nn.Conv2d)
    fan_in = C * 3 * 3
    bound = 1.0 / np.sqrt(fan_in)
    w = jax.random.uniform(kw, (Cout, C, 3, 3), jnp.float32, -bound, bound)
    b = jax.random.uniform(kb, (Cout,), jnp.float32, -bound, bound)

    # Explicit small row tile -> 4-step parallel grid (exercises the pipeline).
    fwd_small = jax.jit(functools.partial(downsample_forward, block_m=32))
    y = jax.block_until_ready(fwd_small(x, w, b))
    assert y.shape == (N, Cout, H // 2, W // 2)

    # Auto (generation-aware) tiling path.
    fwd_auto = jax.jit(downsample_forward)
    y_auto = jax.block_until_ready(fwd_auto(x, w, b))
    assert y_auto.shape == y.shape

    # Tight check: same bf16-rounded operands, f32 accumulation (validates the
    # im2col packing / matmul exactly).
    xb = x.astype(jnp.bfloat16).astype(jnp.float32)
    wb = w.astype(jnp.bfloat16).astype(jnp.float32)
    y_ref_bf16 = lax.conv_general_dilated(
        xb, wb, window_strides=(2, 2), padding=((1, 1), (1, 1)),
        dimension_numbers=("NCHW", "OIHW", "NCHW"),
        precision=lax.Precision.HIGHEST,
    ) + b.reshape(1, Cout, 1, 1)
    assert np.allclose(np.asarray(y), np.asarray(y_ref_bf16), atol=2e-3, rtol=2e-3)
    assert np.allclose(np.asarray(y_auto), np.asarray(y_ref_bf16), atol=2e-3, rtol=2e-3)

    # Loose check against the pure-f32 reference (bf16 MXU operands).
    y_ref_f32 = lax.conv_general_dilated(
        x, w, window_strides=(2, 2), padding=((1, 1), (1, 1)),
        dimension_numbers=("NCHW", "OIHW", "NCHW"),
        precision=lax.Precision.HIGHEST,
    ) + b.reshape(1, Cout, 1, 1)
    assert np.allclose(np.asarray(y), np.asarray(y_ref_f32), atol=7e-2, rtol=7e-2)

    print("KERNEL_OK")
</pallas_src>

<mosaic_0001>
module attributes {stable_mosaic.version = 11 : i64} {
  func.func @_conv_matmul_kernel(%arg0: i32, %arg1: i32, %arg2: memref<32x36xbf16, #tpu.memory_space<vmem>>, %arg3: memref<36x4xbf16, #tpu.memory_space<vmem>>, %arg4: memref<1x4xf32, #tpu.memory_space<vmem>>, %arg5: memref<32x4xf32, #tpu.memory_space<vmem>>) attributes {dimension_semantics = [#tpu.dimension_semantics<parallel>, #tpu.dimension_semantics<parallel>], iteration_bounds = array<i64: 4, 1>, scalar_prefetch = 0 : i64, scratch_operands = 0 : i64, tpu.core_type = #tpu.core_type<tc>, window_params = [{transform_indices = @transform_0, window_bounds = array<i64: 32, 36>}, {transform_indices = @transform_1, window_bounds = array<i64: 36, 4>}, {transform_indices = @transform_2, window_bounds = array<i64: 1, 4>}, {transform_indices = @transform_3, window_bounds = array<i64: 32, 4>}]} {
    %c0 = arith.constant 0 : index
    %c0_0 = arith.constant 0 : index
    %0 = vector.load %arg2[%c0, %c0_0] : memref<32x36xbf16, #tpu.memory_space<vmem>>, vector<32x36xbf16>
    %c0_1 = arith.constant 0 : index
    %c0_2 = arith.constant 0 : index
    %1 = vector.load %arg3[%c0_1, %c0_2] : memref<36x4xbf16, #tpu.memory_space<vmem>>, vector<36x4xbf16>
    %cst = arith.constant dense<0.000000e+00> : vector<32x4xf32>
    %2 = tpu.matmul %0, %1, %cst {dimension_numbers = #tpu.dot_dimension_numbers<[1], [0], [0], [1], [0, 0, 1, 1], [], []>} : vector<32x36xbf16>, vector<36x4xbf16>, vector<32x4xf32> -> vector<32x4xf32>
    %c0_3 = arith.constant 0 : index
    %c0_4 = arith.constant 0 : index
    %3 = vector.load %arg4[%c0_3, %c0_4] : memref<1x4xf32, #tpu.memory_space<vmem>>, vector<1x4xf32>
    %4 = vector.broadcast %3 : vector<1x4xf32> to vector<32x4xf32>
    %5 = arith.addf %2, %4 : vector<32x4xf32>
    %c0_5 = arith.constant 0 : index
    %c0_6 = arith.constant 0 : index
    %6 = vector.load %arg5[%c0_5, %c0_6] : memref<32x4xf32, #tpu.memory_space<vmem>>, vector<32x4xf32>
    tpu.vector_store %arg5[%c0_5, %c0_6], %5 {strides = array<i32>} : memref<32x4xf32, #tpu.memory_space<vmem>>, vector<32x4xf32>,
    return
  }
  func.func @transform_0(%arg0: i32, %arg1: i32) -> (i32, i32) {
    %c0_i32 = arith.constant 0 : i32
    %c0_i32_0 = arith.constant 0 : i32
    return %arg0, %c0_i32 : i32, i32
  }
  func.func @transform_1(%arg0: i32, %arg1: i32) -> (i32, i32) {
    %c0_i32 = arith.constant 0 : i32
    %c0_i32_0 = arith.constant 0 : i32
    return %c0_i32, %arg1 : i32, i32
  }
  func.func @transform_2(%arg0: i32, %arg1: i32) -> (i32, i32) {
    %c0_i32 = arith.constant 0 : i32
    %c0_i32_0 = arith.constant 0 : i32
    return %c0_i32, %arg1 : i32, i32
  }
  func.func @transform_3(%arg0: i32, %arg1: i32) -> (i32, i32) {
    %c0_i32 = arith.constant 0 : i32
    return %arg0, %arg1 : i32, i32
  }
}

</mosaic_0001>

<bundles_post_ra>
// kernel: downsample_forward.1
= control target key start
LH: loop header
LB: loop body
LE: loop exit
PB: predicated region body
PF: predicated region fallthrough
CT: control target
= control target key end

     0   :  { %s544_s12 = smov 0   ;;  %s546_s13 = smov 0   ;;  %s589_s0 = inlined_call_operand.vmem [shape: bf16[128,36], index: 0, kind: input, shape index: {}]   ;;  %s590_s1 = inlined_call_operand.vmem [shape: bf16[36,4], index: 1, kind: input, shape index: {}]   ;;  %s591_s2 = inlined_call_operand.vmem [shape: f32[1,4], index: 2, kind: input, shape index: {}]   ;;  %s592_s3 = inlined_call_operand.vmem [shape: f32[128,4], index: 3, kind: output, shape index: {}]  }
   0x1   :  { %s548_s14 = smov 0  }
   0x2 LB: > { %s25_s15 = sadd.s32 1, %s518_s13  ;;  %p440_p0 = scmp.ge.s32.totalorder %s522_s14, 1  ;;  %s522_s14 = sphi %s548_s14, %s13_s14   ;;  %s518_s13 = sphi %s546_s13, %s594_s13   ;;  %s514_s12 = sphi %s544_s12, %s593_s12  }
   0x3   : > { %p27_p1 = scmp.ge.s32.totalorder %s25_s15, 4  ;;  %p169_p2 = scmp.lt.s32.totalorder %s522_s14, 5 }
   0x5   : > { %s596_s15 = smov (%p27_p1, %s25_s15), 0  ;;  %p170_p3 = pnand %p440_p0, %p169_p2 }
   0x6   : > { %v495_v0 = vld [vmem:[%s590_s1] sm:$0xff] (!%p170_p3)   ;;  %v496_v1 = vld [vmem:[%s590_s1 + $0x8] sm:$0xff] (!%p170_p3)   ;;  %s441_s20 = sshll.u32 (!%p170_p3), %s514_s12, 2  ;;  %v497_v2 = vld [vmem:[%s590_s1 + $0x10] ss:$0 sps:$4 sm:$0x33] (!%p170_p3)  }
   0x7   : > { %173 = sbr.rel (%p170_p3) target bundleno = 237 (0xed), region = 32  ;;  %460 = vmatprep.subr.bf16.mxu0 (!%p170_p3), %v495_v0  ;;  %p204_p4 = scmp.lt.s32.totalorder (!%p170_p3), %s441_s20, 15  ;;  %vm274_vm0 = vcmask (!%p170_p3), 1041408   ;;  %vm267_vm1 = vcmask (!%p170_p3), 293888   ;;  %v445_v6 = vld [vmem:[%s591_s2] ss:$0 sm:$0xff] (!%p170_p3) }
   0x8   : > { %461 = vmatpush3.bf16.msra.mxu0 (!%p170_p3), %v495_v0  ;;  %v276_v3 = vsel (!%p170_p3), %vm274_vm0, %v497_v2, 0  ;;  %vm327_vm2 = vcmask (!%p170_p3), 31744  }
   0x9   : > { %462 = vmatprep.subr.bf16.mxu0 (!%p170_p3), %v496_v1 }
   0xc   : > { %463 = vmatpush3.bf16.msra.mxu0 (!%p170_p3), %v496_v1 }
   0xd   : > { %470 = vmatprep.subr.msk.bf16.mxu0 (!%p170_p3), %vm274_vm0, %v497_v2 }
   0xe   : > { %s598_s20 = smov (!%p204_p4, %s441_s20), 15 }
   0xf   : > { %s442_s23 = sshll.u32 %s598_s20, 2  ;;  %s444_s27 = sshll.u32 %s598_s20, 3 }
  0x10   : > { %s207_s26 = scalar_lea.vmem %s589_s0, %s442_s23  ;;  %465 = vmatpush3.bf16.msra.mxu0 %v276_v3  ;;  %s223_s5 = scalar_lea.vmem %s592_s3, %s444_s27 }
  0x11   : > { %v498_v4 = vld [vmem:[%s207_s26] sm:$0xff]   ;;  %v499_v5 = vld [vmem:[%s207_s26 + $0x8] sm:$0xff]  }
  0x12   : > { %466 = vmatprep.mubr.msk.bf16.mxu0 %vm267_vm1, %v498_v4 }
  0x13   : > { %467 = vmatmul.mubr.msk.bf16.vlgmr.msra.gmra.mrb[0].mxu0 %vm267_vm1, %v499_v5 }
  0xe6   : > { %v468_v7 = vpop.f32.mrb[0].mxu0 }
  0xe7   : > { %v321_v8 = vadd.f32 %v468_v7, %v445_v6  ;;  %v312_v9 = vpop.f32.mrb[1].mxu0 }
  0xe8   : > { %v313_v10 = vadd.f32 %v445_v6, %v312_v9  ;;  %v469_v11 = vpop.f32.mrb[2].mxu0 }
  0xe9   : > { %330 = vst.msk [vmem:[%s223_s5 + $0x10] sm:$0xff] %vm327_vm2, %v321_v8  ;;  %v324_v12 = vadd.f32 %v469_v11, %v445_v6  ;;  %v315_v13 = vpop.f32.mrb[3].mxu0 }
  0xea   : > { %328 = vst.msk [vmem:[%s223_s5] sm:$0xff] %vm327_vm2, %v313_v10  ;;  %v316_v14 = vadd.f32 %v445_v6, %v315_v13 }
  0xeb   : > { %331 = vst.msk [vmem:[%s223_s5 + $0x18] sm:$0xff] %vm327_vm2, %v324_v12 }
  0xec   : > { %329 = vst.msk [vmem:[%s223_s5 + $0x8] sm:$0xff] %vm327_vm2, %v316_v14 }
  0xed PF: > { %s13_s14 = sadd.s32 1, %s522_s14   ;;  %s593_s12 = smov %s518_s13 }
  0xee   : > { %p10_p5 = scmp.ge.s32.totalorder %s13_s14, 6   ;;  %s594_s13 = smov %s596_s15 }
  0xf0   :  { %12 = sbr.rel (!%p10_p5) target bundleno = 2 (0x2), region = 68 }

</bundles_post_ra>
